<compile_context>
chip_gen: v6e
topology: v6e:2x2x1
jax: 0.10.0
libtpu: 0.0.40
codegen_flags: <defaults>
</compile_context>

<pallas_src>
from functools import partial

import jax
import jax.numpy as jnp
from jax.experimental import pallas as pl
from jax.experimental.pallas import tpu as pltpu


_VMEM_LIMIT = 32 * 1024 * 1024   # explicit scoped-VMEM floor (v5e default is only 16 MiB)
_EDGE_TILE_ROWS = 2048           # 2048 x 128 f32 = 1 MiB per stream per buffer
_NODE_TILE_ROWS = 4096           # 16 x 4096 f32 x-block = 256 KiB per buffer


def _round_up(v, m):
    return ((v + m - 1) // m) * m


def _cdiv(a, b):
    return -(-a // b)


def _pick_row_tile(rows, align, target, min_grid):
    """Pick (tile, padded_rows): tile is a multiple of `align`, padded_rows % tile == 0.

    Grows the tile toward `target` rows (amortizes ~0.35us/step pipeline overhead) but
    clamps it so small inputs are not massively zero-padded, and tries to keep at least
    `min_grid` grid steps (v7x megacore split)."""
    rows_al = _round_up(max(rows, align), align)
    n_tiles = max(min_grid, _cdiv(rows_al, target))
    tile = min(_round_up(_cdiv(rows_al, n_tiles), align), rows_al)
    rpad = _round_up(rows_al, tile)
    return tile, rpad


# ---------------------------------------------------------------- kernels ---

def node_kernel(xT_ref, wd_ref, wsdT_ref, abT_ref):
    # hT = Wd @ x^T   (d_liner, bias-free); stays in VMEM/vregs only.
    hT = jnp.dot(wd_ref[...], xT_ref[...], preferred_element_type=jnp.float32)
    # abT[0] = w_s^T @ hT  (= h @ (w1+w3)),  abT[1] = w_d^T @ hT  (= h @ (w2-w3)).
    # Lane-dense (2, tile_n) output block -> unmasked full-vreg stores.
    abT_ref[...] = jnp.dot(wsdT_ref[...], hT, preferred_element_type=jnp.float32)


def edge_kernel(gamma, z_ref, t_ref, score_ref, part_ref):
    # z = xs@w1 + xd@w2 + (xs-xd)@w3  ==  a[src] + b[dst]  (pre-summed in the wrapper).
    z = z_ref[...]                                     # [tile_r, 128]

    # EC.forward: edge_score = sigmoid(f_liner(e_feats))  -- tanh form, 1 EUP push.
    score = 0.5 * (jnp.tanh(0.5 * z) + 1.0)
    score_ref[...] = score                             # lane+sublane dense store

    # FocalLoss.forward applies sigmoid AGAIN to its input (reproduced exactly).
    p = 0.5 * (jnp.tanh(0.5 * score) + 1.0)

    # t encodes label in its sign and |t| = alpha_t * mask  (0 on padded/masked lanes).
    t = t_ref[...]
    w = jnp.abs(t)
    pt = jnp.where(t > 0.0, p, 1.0 - p)
    logpt = jnp.log(pt)                                # single log per element
    one_m = 1.0 - pt
    if gamma == 2.0:                                   # static Python branch
        focal = one_m * one_m
    else:
        focal = one_m ** gamma
    loss = -focal * logpt * w                          # == loss_i * at * mask

    # Lane-dense per-tile partial (1, 1, 128); global masked mean finalized in wrapper.
    part_ref[...] = jnp.sum(loss, axis=0, keepdims=True)[None]


# --------------------------------------------------------------- wrappers ---

def node_ab(xT, wd, wsdT, tile_n):
    """abT = [w_s | w_d]^T @ (Wd @ x^T)  -> [2, N_pad] (lane-dense)."""
    c_in, n_pad = xT.shape
    c_out = wd.shape[0]
    grid = (n_pad // tile_n,)
    return pl.pallas_call(
        node_kernel,
        out_shape=jax.ShapeDtypeStruct((2, n_pad), jnp.float32),
        grid=grid,
        in_specs=[pl.BlockSpec((c_in, tile_n), lambda i: (0, i)),
                  pl.BlockSpec((c_out, c_in), lambda i: (0, 0)),    # resident
                  pl.BlockSpec((2, c_out), lambda i: (0, 0))],      # resident
        out_specs=pl.BlockSpec((2, tile_n), lambda i: (0, i)),
        compiler_params=pltpu.CompilerParams(
            dimension_semantics=("parallel",),
            vmem_limit_bytes=_VMEM_LIMIT),
        cost_estimate=pl.CostEstimate(
            flops=2 * n_pad * c_in * c_out + 2 * n_pad * c_out * 2,
            transcendentals=0,
            bytes_accessed=4 * (n_pad * c_in + c_out * c_in + 2 * c_out + 2 * n_pad)),
    )(xT, wd, wsdT)


def edge_focal(z2, t2, gamma, tile_r):
    """Edge scores (dense [R,128] slab) + per-tile lane-dense focal partial sums."""
    r_pad, lane = z2.shape
    grid_sz = r_pad // tile_r
    kern = partial(edge_kernel, float(gamma))
    return pl.pallas_call(
        kern,
        out_shape=(jax.ShapeDtypeStruct((r_pad, lane), jnp.float32),
                   jax.ShapeDtypeStruct((grid_sz, 1, lane), jnp.float32)),
        grid=(grid_sz,),
        in_specs=[pl.BlockSpec((tile_r, lane), lambda i: (i, 0)),
                  pl.BlockSpec((tile_r, lane), lambda i: (i, 0))],
        out_specs=(pl.BlockSpec((tile_r, lane), lambda i: (i, 0)),
                   pl.BlockSpec((1, 1, lane), lambda i: (i, 0, 0))),
        compiler_params=pltpu.CompilerParams(
            dimension_semantics=("parallel",),
            vmem_limit_bytes=_VMEM_LIMIT),
        cost_estimate=pl.CostEstimate(
            flops=10 * r_pad * lane,
            transcendentals=3 * r_pad * lane,
            bytes_accessed=4 * (3 * r_pad * lane + grid_sz * lane)),
    )(z2, t2)


def ec_forward(params, x, edge_index, edge_labels, edge_train_mask, alpha, gamma):
    """Reproduces EC.forward + FocalLoss (dropout treated as identity / eval mode)."""
    wd = params["d_liner_w"].astype(jnp.float32)      # [Cout, Cin]
    wf = params["f_liner_w"].astype(jnp.float32)      # [1, 3*Cout]
    c_out, _ = wd.shape
    alpha = float(alpha)

    # Fold the three concat segments: w_s = w1 + w3, w_d = w2 - w3  (rows of wsdT).
    w1 = wf[:, 0 * c_out:1 * c_out]
    w2 = wf[:, 1 * c_out:2 * c_out]
    w3 = wf[:, 2 * c_out:3 * c_out]
    wsdT = jnp.concatenate([w1 + w3, w2 - w3], axis=0)   # [2, Cout]

    # ---- node kernel (tiled over N, lane-dense transposed output) ----
    n = x.shape[0]
    tile_n, n_pad = _pick_row_tile(n, 128, _NODE_TILE_ROWS, 1)
    xT = jnp.pad(x.astype(jnp.float32), ((0, n_pad - n), (0, 0))).T   # [Cin, N_pad]
    abT = node_ab(xT, wd, wsdT, tile_n)                               # [2, N_pad]

    # Tiny scalar gather + pre-sum (2*E*4 B read) -- plain-JAX glue, fuses into the gather.
    z = abT[0, edge_index[0]] + abT[1, edge_index[1]]                 # [E]

    # Fold label/mask/alpha into one signed per-edge weight.
    lab = edge_labels.astype(jnp.float32)
    mask = edge_train_mask.astype(jnp.float32)
    at = jnp.where(lab > 0.5, 1.0 - alpha, alpha)
    t = jnp.where(lab > 0.5, at, -at) * mask                          # [E]

    # ---- edge kernel (adaptive (tile_r, 128) tiles, parallel) ----
    e = edge_index.shape[1]
    lane = 128
    r = _cdiv(e, lane)
    tile_r, r_pad = _pick_row_tile(r, 8, _EDGE_TILE_ROWS, 2)
    e_pad = r_pad * lane

    def to2d(v):
        return jnp.pad(v, (0, e_pad - e)).reshape(r_pad, lane)

    score2, parts = edge_focal(to2d(z), to2d(t), gamma, tile_r)

    edge_score = score2.reshape(-1)[:e]
    edge_loss = jnp.sum(parts) / jnp.sum(mask)
    return edge_score, edge_loss


# ------------------------------------------------------------- reference ----

def ec_reference(params, x, edge_index, edge_labels, edge_train_mask, alpha, gamma):
    wd, wf = params["d_liner_w"], params["f_liner_w"]
    h = x @ wd.T
    e = jnp.concatenate(
        [h[edge_index[0]], h[edge_index[1]],
         h[edge_index[0]] - h[edge_index[1]]], axis=1)
    score = jax.nn.sigmoid((e @ wf.T)[:, 0])
    p = jax.nn.sigmoid(score)
    lab = edge_labels.astype(jnp.float32)
    logpt = jnp.where(lab == 1.0, jnp.log(p), jnp.log(1.0 - p))
    pt = jnp.exp(logpt)
    at = jnp.where(lab == 1.0, 1.0 - alpha, alpha)
    loss_i = -1.0 * (1.0 - pt) ** gamma * (logpt * at)
    m = edge_train_mask.astype(jnp.float32)
    return score, jnp.sum(loss_i * m) / jnp.sum(m)


# ------------------------------------------------------------------ main ----

if __name__ == "__main__":
    N, C_IN, C_OUT, E = 300, 16, 32, 2000
    ALPHA, GAMMA = 0.25, 2.0

    key = jax.random.PRNGKey(0)
    k_x, k_wd, k_wf, k_ei, k_lab, k_mask = jax.random.split(key, 6)

    x = jax.random.normal(k_x, (N, C_IN), dtype=jnp.float32)

    # deterministic PyTorch-style Linear init: U(-1/sqrt(fan_in), 1/sqrt(fan_in))
    kd = 1.0 / (C_IN ** 0.5)
    kf = 1.0 / ((3 * C_OUT) ** 0.5)
    params = {
        "d_liner_w": jax.random.uniform(k_wd, (C_OUT, C_IN),
                                        minval=-kd, maxval=kd, dtype=jnp.float32),
        "f_liner_w": jax.random.uniform(k_wf, (1, 3 * C_OUT),
                                        minval=-kf, maxval=kf, dtype=jnp.float32),
    }

    edge_index = jax.random.randint(k_ei, (2, E), 0, N, dtype=jnp.int32)
    edge_labels = jax.random.bernoulli(k_lab, 0.5, (E,)).astype(jnp.float32)
    edge_train_mask = jax.random.bernoulli(k_mask, 0.75, (E,))
    edge_train_mask = edge_train_mask.at[0].set(True)   # >= 1 train edge

    edge_score, edge_loss = ec_forward(params, x, edge_index, edge_labels,
                                       edge_train_mask, ALPHA, GAMMA)
    jax.block_until_ready((edge_score, edge_loss))

    ref_score, ref_loss = ec_reference(params, x, edge_index, edge_labels,
                                       edge_train_mask, ALPHA, GAMMA)

    assert edge_score.shape == (E,)
    # Small margin over 1e-5: the weight fold / pre-summed z reorder fp32 sums slightly.
    assert jnp.allclose(edge_score, ref_score, atol=2e-5, rtol=1e-4)
    assert jnp.allclose(edge_loss, ref_loss, atol=2e-5, rtol=1e-4)
    assert bool(jnp.isfinite(edge_loss))

    print("KERNEL_OK")
</pallas_src>

<mosaic_0001>
module attributes {stable_mosaic.version = 11 : i64} {
  func.func @node_kernel(%arg0: i32, %arg1: memref<16x384xf32, #tpu.memory_space<vmem>>, %arg2: memref<32x16xf32, #tpu.memory_space<vmem>>, %arg3: memref<2x32xf32, #tpu.memory_space<vmem>>, %arg4: memref<2x384xf32, #tpu.memory_space<vmem>>) attributes {dimension_semantics = [#tpu.dimension_semantics<parallel>], iteration_bounds = array<i64: 1>, scalar_prefetch = 0 : i64, scratch_operands = 0 : i64, tpu.core_type = #tpu.core_type<tc>, window_params = [{transform_indices = @transform_0, window_bounds = array<i64: 16, 384>}, {pipeline_mode = #tpu.pipeline_mode<synchronous>, transform_indices = @transform_1, window_bounds = array<i64: 32, 16>}, {pipeline_mode = #tpu.pipeline_mode<synchronous>, transform_indices = @transform_2, window_bounds = array<i64: 2, 32>}, {transform_indices = @transform_3, window_bounds = array<i64: 2, 384>}]} {
    %c0 = arith.constant 0 : index
    %c0_0 = arith.constant 0 : index
    %0 = vector.load %arg2[%c0, %c0_0] : memref<32x16xf32, #tpu.memory_space<vmem>>, vector<32x16xf32>
    %c0_1 = arith.constant 0 : index
    %c0_2 = arith.constant 0 : index
    %1 = vector.load %arg1[%c0_1, %c0_2] : memref<16x384xf32, #tpu.memory_space<vmem>>, vector<16x384xf32>
    %cst = arith.constant dense<0.000000e+00> : vector<32x384xf32>
    %2 = tpu.matmul %0, %1, %cst {dimension_numbers = #tpu.dot_dimension_numbers<[1], [0], [0], [1], [0, 0, 1, 1], [], []>} : vector<32x16xf32>, vector<16x384xf32>, vector<32x384xf32> -> vector<32x384xf32>
    %c0_3 = arith.constant 0 : index
    %c0_4 = arith.constant 0 : index
    %3 = vector.load %arg3[%c0_3, %c0_4] : memref<2x32xf32, #tpu.memory_space<vmem>>, vector<2x32xf32>
    %cst_5 = arith.constant dense<0.000000e+00> : vector<2x384xf32>
    %4 = tpu.matmul %3, %2, %cst_5 {dimension_numbers = #tpu.dot_dimension_numbers<[1], [0], [0], [1], [0, 0, 1, 1], [], []>} : vector<2x32xf32>, vector<32x384xf32>, vector<2x384xf32> -> vector<2x384xf32>
    %c0_6 = arith.constant 0 : index
    %c0_7 = arith.constant 0 : index
    %5 = vector.load %arg4[%c0_6, %c0_7] : memref<2x384xf32, #tpu.memory_space<vmem>>, vector<2x384xf32>
    tpu.vector_store %arg4[%c0_6, %c0_7], %4 {strides = array<i32>} : memref<2x384xf32, #tpu.memory_space<vmem>>, vector<2x384xf32>,
    return
  }
  func.func @transform_0(%arg0: i32) -> (i32, i32) {
    %c0_i32 = arith.constant 0 : i32
    %c0_i32_0 = arith.constant 0 : i32
    return %c0_i32, %arg0 : i32, i32
  }
  func.func @transform_1(%arg0: i32) -> (i32, i32) {
    %c0_i32 = arith.constant 0 : i32
    %c0_i32_0 = arith.constant 0 : i32
    %c0_i32_1 = arith.constant 0 : i32
    return %c0_i32, %c0_i32_0 : i32, i32
  }
  func.func @transform_2(%arg0: i32) -> (i32, i32) {
    %c0_i32 = arith.constant 0 : i32
    %c0_i32_0 = arith.constant 0 : i32
    %c0_i32_1 = arith.constant 0 : i32
    return %c0_i32, %c0_i32_0 : i32, i32
  }
  func.func @transform_3(%arg0: i32) -> (i32, i32) {
    %c0_i32 = arith.constant 0 : i32
    %c0_i32_0 = arith.constant 0 : i32
    return %c0_i32, %arg0 : i32, i32
  }
}

</mosaic_0001>

<bundles_post_ra>
// kernel: tpu_custom_call.1
= control target key start
LH: loop header
LB: loop body
LE: loop exit
PB: predicated region body
PF: predicated region fallthrough
CT: control target
= control target key end

     0   :  { %vm25_vm0 = vcmask 130048   ;;  %s533_s0 = inlined_call_operand.vmem [shape: f32[16,384], index: 0, kind: input, shape index: {}]   ;;  %s534_s1 = inlined_call_operand.vmem [shape: f32[32,16], index: 1, kind: input, shape index: {}]   ;;  %s535_s2 = inlined_call_operand.vmem [shape: f32[2,32], index: 2, kind: input, shape index: {}]   ;;  %s536_s3 = inlined_call_operand.hbm [shape: f32[2,384], index: 3, kind: output, shape index: {}]  }
   0x1   :  { %v23_v0 = vld [vmem:[%s533_s0 + $0x20] sm:$0xff]  ;;  %v22_v1 = vld [vmem:[%s533_s0 + $0x18] sm:$0xff]  ;;  %v20_v2 = vld [vmem:[%s533_s0 + $0x8] sm:$0xff] }
   0x2   :  { %66 = vmatprep.subr.mxu0 %v23_v0  ;;  %435 = vmatprep.subr.mxu1 %v23_v0  ;;  %v19_v3 = vld [vmem:[%s533_s0] sm:$0xff]  ;;  %v18_v5 = vld [vmem:[%s534_s1 + $0x18] sm:$0xff] }
   0x3   :  { %67 = vmatpush1.msra.mxu0 %v22_v1  ;;  %437 = vmatpush1.msra.mxu1 %v22_v1  ;;  %v15_v4 = vld [vmem:[%s534_s1] sm:$0xff] }
   0x4   :  { %68 = vmatprep.subr.mxu0 %v20_v2  ;;  %436 = vmatprep.subr.mxu1 %v20_v2 }
   0x5   :  { %8 = vsyncpa [#allocation3], 0  ;;  %69 = vmatpush1.msra.mxu0 %v19_v3  ;;  %438 = vmatpush1.msra.mxu1 %v19_v3  ;;  %v24_v6 = vld [vmem:[%s533_s0 + $0x28] sm:$0xff]  ;;  %v465_v7 = vmov 0.0   ;;  %v21_v8 = vld [vmem:[%s533_s0 + $0x10] sm:$0xff]  ;;  %vm466_vm1 = vmmov 0   ;;  %v365_v26 = vlaneseq }
   0x6   :  { %102 = vmatprep.mubr.f32.mxu0 %v465_v7  ;;  %120 = vmatprep.mubr.f32.mxu1 %v465_v7  ;;  %v16_v9 = vld [vmem:[%s534_s1 + $0x8] sm:$0xff]  ;;  %v17_v10 = vld [vmem:[%s534_s1 + $0x10] sm:$0xff]  ;;  %v212_v23 = vld [vmem:[%s535_s2] sm:$0x3]  ;;  %vm213_vm2 = vcmask 261120   ;;  %s468_s2 = smov [#allocation2]  }
   0x7   :  { %393 = vmatmul.mubr.msk.f32.vlgmr.msra.gmra.mxu0 %vm25_vm0, %v15_v4  ;;  %396 = vmatmul.mubr.msk.f32.vlgmr.msra.gmra.mxu1 %vm25_vm0, %v18_v5  ;;  %v467_v24 = vmov 1983009808   ;;  %v366_v28 = vshrl.u32 %v365_v26, 7  ;;  %s385_s5 = sshll.u32 %s468_s2, 4  ;;  %s386_s5 = int_to_ptr.vmem [resolvable:$true] %s385_s5 }
   0x8   :  { %414 = vmatprep.subr.mxu1 %v24_v6  ;;  %108 = vmatprep.mubr.f32.mxu0 %v465_v7  ;;  %v363_v25 = vunpack.c.l.s4 %v467_v24  ;;  %s443_s6 = scalar_lea.vmem %s386_s5, 96  ;;  %p448_p1 = scmp.lt.s32.totalorder %s386_s5, %s386_s5 }
   0x9   :  { %415 = vmatpush3.msra.mxu1 %v24_v6  ;;  %418 = vmatprep.mubr.msk.f32.mxu1 %vm25_vm0, %v15_v4  ;;  %p444_p0 = scmp.ne.s32.totalorder %s386_s5, %s443_s6  ;;  %p449_p2 = scmp.lt.s32.totalorder %s443_s6, %s443_s6 }
   0xa   :  { %416 = vmatprep.subr.mxu1 %v21_v8  ;;  %424 = vmatprep.subr.mxu0 %v465_v7  ;;  %v364_v27 = vunpack.c.0.s8 %v363_v25 }
   0xb   :  { %417 = vmatpush3.msra.mxu1 %v21_v8  ;;  %394 = vmatmul.mubr.msk.f32.gmra.mxu0 %vm25_vm0, %v16_v9  ;;  %p450_p3 = por %p449_p2, %p448_p1 }
   0xc   :  { %419 = vmatmul.mubr.msk.f32.vlgmr.msra.gmra.mxu1 %vm25_vm0, %v16_v9  ;;  %114 = vmatprep.mubr.f32.mxu0 %v465_v7  ;;  %v367_v29 = vsub.s32 %v364_v27, %v366_v28 }
   0xd   :  { %421 = vmatprep.mubr.msk.f32.mxu1 %vm25_vm0, %v17_v10  ;;  %p451_p4 = pnand %p450_p3, %p444_p0 }
   0xf   :  { %395 = vmatmul.mubr.msk.f32.gmra.mxu0 %vm25_vm0, %v17_v10 }
  0x10   :  { %422 = vmatmul.mubr.msk.f32.gmra.mxu1 %vm25_vm0, %v18_v5  ;;  %432 = vmatprep.mubr.msk.f32.mxu0 %vm466_vm1, %v465_v7 }
  0x11   :  { %281 = vmatprep.mubr.f32.mxu1 %v465_v7 }
  0xc7   :  { %v104_v11 = vpop.f32.mrf.mxu0  ;;  %v122_v12 = vpop.f32.mrf.mxu1 }
  0xc9   :  { %v106_v13 = vpop.f32.mrf.mxu0  ;;  %v124_v14 = vpop.f32.mrf.mxu1 }
  0xca   :  { %241 = vmatprep.subr.mxu1 %v124_v14 }
  0xcb   :  { %v110_v15 = vpop.f32.mrf.mxu0  ;;  %242 = vmatpush1.msra.mxu1 %v122_v12 }
  0xcc   :  { %v420_v16 = vpop.f32.mrf.mxu1 }
  0xcd   :  { %v112_v17 = vpop.f32.mrf.mxu0 }
  0xce   :  { %v193_v18 = vpop.f32.mrf.mxu1 }
  0xcf   :  { %v116_v19 = vpop.f32.mrf.mxu0 }
  0xd0   :  { %v423_v20 = vpop.f32.mrf.mxu1 }
  0xd1   :  { %425 = vmatpush3.msra.mxu0 %v423_v20  ;;  %v118_v21 = vpop.f32.mrf.mxu0 }
  0xd2   :  { %v203_v22 = vpop.f32.mrf.mxu1  ;;  %426 = vmatprep.subr.mxu0 %v465_v7  ;;  %243 = vmatprep.subr.mxu1 %v118_v21 }
  0xd3   :  { %427 = vmatpush3.msra.mxu0 %v203_v22  ;;  %244 = vmatpush1.msra.mxu1 %v116_v19 }
  0xd4   :  { %428 = vmatprep.subr.mxu0 %v465_v7  ;;  %245 = vmatprep.subr.mxu1 %v112_v17 }
  0xd5   :  { %429 = vmatpush3.msra.mxu0 %v420_v16  ;;  %246 = vmatpush1.msra.mxu1 %v110_v15 }
  0xd6   :  { %430 = vmatprep.subr.mxu0 %v465_v7  ;;  %247 = vmatprep.subr.mxu1 %v106_v13 }
  0xd7   :  { %431 = vmatpush3.msra.mxu0 %v193_v18  ;;  %248 = vmatpush1.msra.mxu1 %v104_v11 }
  0xd8   :  { %401 = vmatmul.mubr.msk.f32.vlgmr.msra.gmra.mxu1 %vm213_vm2, %v212_v23  ;;  %433 = vmatmul.mubr.msk.f32.vlgmr.msra.gmra.mxu0 %vm213_vm2, %v212_v23 }
 0x198   :  { %v283_v30 = vpop.f32.mrf.mxu1  ;;  %v354_v31 = vpop.f32.mrf.mxu0 }
 0x199   :  { %v375_v35 = vrot.slane %v354_v31, %v367_v29 }
 0x19a   :  { %v285_v32 = vpop.f32.mrf.mxu1  ;;  %v434_v33 = vpop.f32.mrf.mxu0 }
 0x19b   :  { %v361_v34 = vcombine.low %v283_v30, %v285_v32 }
 0x19d   :  { %v368_v36 = vrot.slane %v361_v34, %v367_v29 }
 0x19f   :  { %v376_v37 = vcombine.low %v368_v36, %v375_v35 }
 0x1a1   :  { %378 = vst [vmem:[#allocation2] sm:$0x3f] %v376_v37 }
 0x1a2   :  { %454 = shalt.err (!%p451_p4)
}
 0x1a3   :  { %388 = dma.vmem_to_hbm [thread:$0]  %s386_s5, 96, %s536_s3, [#allocation3]  }
 0x1a4   :  { %463 = dma.done.wait [#allocation3], 96  }
 0x1a5   :  { %464 = vsyncadd [#allocation3], 4294967200 }
 0x1a6   :  { %392 = vsyncpa [#allocation3], 1 }

</bundles_post_ra>
